<compile_context>
chip_gen: v7x
topology: tpu7x:2x2x1
jax: 0.10.0
libtpu: 0.0.40
codegen_flags: <defaults>
</compile_context>

<pallas_src>
import functools

import jax
import jax.numpy as jnp
from jax import lax
from jax.experimental import pallas as pl
from jax.experimental.pallas import tpu as pltpu


def _mlp_attn_kernel(x_ref, wf_ref, bf_ref, w1_ref, b1_ref, w2_ref, b2_ref,
                     wo_ref, bo_ref, out_ref, *, hidden, mxu_dtype):
    """Fused forward for one batch tile.

    x tile is batch-major [tile_n, D_in]; the first matmul contracts over D_in
    on both operands so all downstream math is feature-major [*, tile_n].

    fused = Wf @ x^T + bf          (Wf = concat[Wu; Wv; W0], [3H, D_in])
    U = tanh(fused[0:H]) ; V = tanh(fused[H:2H]) ; dUV = V - U
    a = fused[2H:3H]     ; alpha = tanh(U + a*dUV)
    for (W, b) in (W1,b1),(W2,b2):  a = W @ alpha + b ; alpha = tanh(U + a*dUV)
    out = Wo @ alpha + bo
    """
    H = hidden
    x = x_ref[...]                                         # [tile_n, D_in]
    wf = wf_ref[...]                                       # [3H, D_in]
    if mxu_dtype != jnp.float32:
        x = x.astype(mxu_dtype)
        wf = wf.astype(mxu_dtype)

    # Contract over D_in on both sides -> [3H, tile_n]; the relayout of x is
    # absorbed into the in-kernel MXU/XLU path instead of a host transpose.
    fused = lax.dot_general(wf, x, (((1,), (1,)), ((), ())),
                            preferred_element_type=jnp.float32) + bf_ref[...]

    U = jnp.tanh(fused[0:H, :])                            # [H, tile_n]
    dUV = jnp.tanh(fused[H:2 * H, :]) - U                  # V - U (V not kept live)
    a = fused[2 * H:3 * H, :]                              # [H, tile_n]
    alpha = jnp.tanh(U + a * dUV)

    for w_ref, b_ref in ((w1_ref, b1_ref), (w2_ref, b2_ref)):
        w = w_ref[...]
        lhs = alpha
        if mxu_dtype != jnp.float32:
            w = w.astype(mxu_dtype)
            lhs = lhs.astype(mxu_dtype)
        a = jnp.dot(w, lhs, preferred_element_type=jnp.float32) + b_ref[...]
        alpha = jnp.tanh(U + a * dUV)

    wo = wo_ref[...]
    if mxu_dtype != jnp.float32:
        wo = wo.astype(mxu_dtype)
        alpha = alpha.astype(mxu_dtype)
    out_ref[...] = (jnp.dot(wo, alpha, preferred_element_type=jnp.float32)
                    + bo_ref[...]).astype(out_ref.dtype)   # [D_out, tile_n]


def _choose_tile_n(N, cap=512):
    """Largest multiple of 128 dividing N, <= cap, keeping >= 4 grid steps
    (>= 2 steps per TensorCore on v7x so DMA prefetch/writeback overlaps)."""
    assert N % 128 == 0, "batch must be a multiple of 128"
    target = min(cap, max(128, N // 4))
    best = 128
    cand = 128
    while cand <= target:
        if N % cand == 0:
            best = cand
        cand += 128
    return best


def mlp_with_attention_pallas(x, params, *, tile_n=None, use_bf16_mxu=False):
    """x: [N, D_in] float32. params: dict of torch-style [out, in] weights and
    [out, 1] biases (see init_params). Returns [N, D_out]."""
    N, D_in = x.shape
    H = params["W1"].shape[0]
    D_out = params["Wo"].shape[0]
    assert H % 8 == 0, "hidden size must be a multiple of 8 (sublane-aligned splits)"

    if tile_n is None:
        tile_n = _choose_tile_n(N)
    assert N % tile_n == 0

    # Fuse the three D_in -> H projections into one weight / bias (once, on host).
    Wf = jnp.concatenate([params["Wu"], params["Wv"], params["W0"]], axis=0)
    bf = jnp.concatenate([params["bu"], params["bv"], params["b0"]], axis=0)

    grid = (N // tile_n,)

    def full(arr):
        nd = arr.ndim
        return pl.BlockSpec(arr.shape, lambda i: (0,) * nd)

    in_specs = [
        pl.BlockSpec((tile_n, D_in), lambda i: (i, 0)),   # x, batch-tiled (no host x.T)
        full(Wf), full(bf),
        full(params["W1"]), full(params["b1"]),
        full(params["W2"]), full(params["b2"]),
        full(params["Wo"]), full(params["bo"]),
    ]
    out_spec = pl.BlockSpec((D_out, tile_n), lambda i: (0, i))

    weight_bytes = 4 * (3 * H * D_in + 3 * H + 2 * H * H + 2 * H
                        + H * D_out + D_out)
    cost = pl.CostEstimate(
        flops=2 * N * (3 * D_in * H + 2 * H * H + H * D_out),
        transcendentals=5 * N * H,
        bytes_accessed=4 * N * (D_in + D_out) + weight_bytes,
    )

    mxu_dtype = jnp.bfloat16 if use_bf16_mxu else jnp.float32

    out_t = pl.pallas_call(
        functools.partial(_mlp_attn_kernel, hidden=H, mxu_dtype=mxu_dtype),
        out_shape=jax.ShapeDtypeStruct((D_out, N), jnp.float32),
        grid_spec=pltpu.PrefetchScalarGridSpec(
            num_scalar_prefetch=0,
            grid=grid,
            in_specs=in_specs,
            out_specs=out_spec,
        ),
        compiler_params=pltpu.CompilerParams(
            dimension_semantics=("parallel",)),
        cost_estimate=cost,
    )(x, Wf, bf,
      params["W1"], params["b1"], params["W2"], params["b2"],
      params["Wo"], params["bo"])

    # Output stays lane-dense [D_out, N] in the kernel; the final relayout is
    # only D_out*N floats (tiny for D_out=4).
    return out_t.T


# ------------------------- parameter init (deterministic) -------------------


def _xavier_uniform(key, fan_out, fan_in, dtype=jnp.float32):
    # torch-style weight layout: [out_features, in_features]
    limit = (6.0 / (fan_in + fan_out)) ** 0.5
    return jax.random.uniform(key, (fan_out, fan_in), dtype,
                              minval=-limit, maxval=limit)


def init_params(key, input_size, hidden_size, output_size,
                num_hidden_layers=3):
    assert num_hidden_layers == 3, "kernel is specialized for 3 hidden layers"
    keys = jax.random.split(key, 6)
    zeros = lambda n: jnp.zeros((n, 1), jnp.float32)   # bias as [out, 1]
    params = {
        "Wu": _xavier_uniform(keys[0], hidden_size, input_size), "bu": zeros(hidden_size),
        "Wv": _xavier_uniform(keys[1], hidden_size, input_size), "bv": zeros(hidden_size),
        "W0": _xavier_uniform(keys[2], hidden_size, input_size), "b0": zeros(hidden_size),
        "W1": _xavier_uniform(keys[3], hidden_size, hidden_size), "b1": zeros(hidden_size),
        "W2": _xavier_uniform(keys[4], hidden_size, hidden_size), "b2": zeros(hidden_size),
        "Wo": _xavier_uniform(keys[5], output_size, hidden_size), "bo": zeros(output_size),
    }
    return params


def reference_forward(x, p):
    """Pure-JAX reference mirroring the PyTorch forward (activation='tanh')."""
    act = jnp.tanh
    U = act(x @ p["Wu"].T + p["bu"].T)
    V = act(x @ p["Wv"].T + p["bv"].T)
    alpha = x
    for W, b in ((p["W0"], p["b0"]), (p["W1"], p["b1"]), (p["W2"], p["b2"])):
        a = alpha @ W.T + b.T
        alpha = act((1.0 - a) * U + a * V)
    return alpha @ p["Wo"].T + p["bo"].T


# TODO(synk): siren=True and positional_encoding=True branches of the module
# are not implemented (defaults are siren=False, no Fourier features; the
# module's default activation='identity' returns None in the original code,
# so 'tanh' is used instead).

if __name__ == "__main__":
    key = jax.random.PRNGKey(0)
    k_x, k_p = jax.random.split(key)

    N, D_in, H, D_out = 512, 8, 32, 4
    x = jax.random.normal(k_x, (N, D_in), jnp.float32)
    params = init_params(k_p, D_in, H, D_out, num_hidden_layers=3)

    out = mlp_with_attention_pallas(x, params)
    out = jax.block_until_ready(out)

    ref = reference_forward(x, params)
    assert out.shape == (N, D_out)
    assert jnp.allclose(out, ref, atol=1e-5, rtol=1e-5), "mismatch vs reference"

    print("KERNEL_OK")
</pallas_src>

<mosaic_0001>
module attributes {stable_mosaic.version = 11 : i64} {
  func.func @_mlp_attn_kernel(%arg0: i32, %arg1: memref<128x8xf32, #tpu.memory_space<vmem>>, %arg2: memref<96x8xf32, #tpu.memory_space<vmem>>, %arg3: memref<96x1xf32, #tpu.memory_space<vmem>>, %arg4: memref<32x32xf32, #tpu.memory_space<vmem>>, %arg5: memref<32x1xf32, #tpu.memory_space<vmem>>, %arg6: memref<32x32xf32, #tpu.memory_space<vmem>>, %arg7: memref<32x1xf32, #tpu.memory_space<vmem>>, %arg8: memref<4x32xf32, #tpu.memory_space<vmem>>, %arg9: memref<4x1xf32, #tpu.memory_space<vmem>>, %arg10: memref<4x128xf32, #tpu.memory_space<vmem>>) attributes {dimension_semantics = [#tpu.dimension_semantics<parallel>], iteration_bounds = array<i64: 4>, scalar_prefetch = 0 : i64, scratch_operands = 0 : i64, tpu.core_type = #tpu.core_type<tc>, window_params = [{transform_indices = @transform_0, window_bounds = array<i64: 128, 8>}, {pipeline_mode = #tpu.pipeline_mode<synchronous>, transform_indices = @transform_1, window_bounds = array<i64: 96, 8>}, {pipeline_mode = #tpu.pipeline_mode<synchronous>, transform_indices = @transform_2, window_bounds = array<i64: 96, 1>}, {pipeline_mode = #tpu.pipeline_mode<synchronous>, transform_indices = @transform_3, window_bounds = array<i64: 32, 32>}, {pipeline_mode = #tpu.pipeline_mode<synchronous>, transform_indices = @transform_4, window_bounds = array<i64: 32, 1>}, {pipeline_mode = #tpu.pipeline_mode<synchronous>, transform_indices = @transform_5, window_bounds = array<i64: 32, 32>}, {pipeline_mode = #tpu.pipeline_mode<synchronous>, transform_indices = @transform_6, window_bounds = array<i64: 32, 1>}, {pipeline_mode = #tpu.pipeline_mode<synchronous>, transform_indices = @transform_7, window_bounds = array<i64: 4, 32>}, {pipeline_mode = #tpu.pipeline_mode<synchronous>, transform_indices = @transform_8, window_bounds = array<i64: 4, 1>}, {transform_indices = @transform_9, window_bounds = array<i64: 4, 128>}]} {
    %c0 = arith.constant 0 : index
    %c0_0 = arith.constant 0 : index
    %0 = vector.load %arg1[%c0, %c0_0] : memref<128x8xf32, #tpu.memory_space<vmem>>, vector<128x8xf32>
    %c0_1 = arith.constant 0 : index
    %c0_2 = arith.constant 0 : index
    %1 = vector.load %arg2[%c0_1, %c0_2] : memref<96x8xf32, #tpu.memory_space<vmem>>, vector<96x8xf32>
    %cst = arith.constant dense<0.000000e+00> : vector<96x128xf32>
    %2 = tpu.matmul %1, %0, %cst {dimension_numbers = #tpu.dot_dimension_numbers<[1], [1], [0], [0], [0, 0, 1, 0], [], []>} : vector<96x8xf32>, vector<128x8xf32>, vector<96x128xf32> -> vector<96x128xf32>
    %c0_3 = arith.constant 0 : index
    %c0_4 = arith.constant 0 : index
    %3 = vector.load %arg3[%c0_3, %c0_4] : memref<96x1xf32, #tpu.memory_space<vmem>>, vector<96x1xf32>
    %4 = vector.broadcast %3 : vector<96x1xf32> to vector<96x128xf32>
    %5 = arith.addf %2, %4 : vector<96x128xf32>
    %6 = vector.extract_strided_slice %5 {offsets = [0, 0], sizes = [32, 128], strides = [1, 1]} : vector<96x128xf32> to vector<32x128xf32>
    %7 = math.tanh %6 : vector<32x128xf32>
    %8 = vector.extract_strided_slice %5 {offsets = [32, 0], sizes = [32, 128], strides = [1, 1]} : vector<96x128xf32> to vector<32x128xf32>
    %9 = math.tanh %8 : vector<32x128xf32>
    %10 = arith.subf %9, %7 : vector<32x128xf32>
    %11 = vector.extract_strided_slice %5 {offsets = [64, 0], sizes = [32, 128], strides = [1, 1]} : vector<96x128xf32> to vector<32x128xf32>
    %12 = arith.mulf %11, %10 : vector<32x128xf32>
    %13 = arith.addf %7, %12 : vector<32x128xf32>
    %14 = math.tanh %13 : vector<32x128xf32>
    %c0_5 = arith.constant 0 : index
    %c0_6 = arith.constant 0 : index
    %15 = vector.load %arg4[%c0_5, %c0_6] : memref<32x32xf32, #tpu.memory_space<vmem>>, vector<32x32xf32>
    %cst_7 = arith.constant dense<0.000000e+00> : vector<32x128xf32>
    %16 = tpu.matmul %15, %14, %cst_7 {dimension_numbers = #tpu.dot_dimension_numbers<[1], [0], [0], [1], [0, 0, 1, 1], [], []>} : vector<32x32xf32>, vector<32x128xf32>, vector<32x128xf32> -> vector<32x128xf32>
    %c0_8 = arith.constant 0 : index
    %c0_9 = arith.constant 0 : index
    %17 = vector.load %arg5[%c0_8, %c0_9] : memref<32x1xf32, #tpu.memory_space<vmem>>, vector<32x1xf32>
    %18 = vector.broadcast %17 : vector<32x1xf32> to vector<32x128xf32>
    %19 = arith.addf %16, %18 : vector<32x128xf32>
    %20 = arith.mulf %19, %10 : vector<32x128xf32>
    %21 = arith.addf %7, %20 : vector<32x128xf32>
    %22 = math.tanh %21 : vector<32x128xf32>
    %c0_10 = arith.constant 0 : index
    %c0_11 = arith.constant 0 : index
    %23 = vector.load %arg6[%c0_10, %c0_11] : memref<32x32xf32, #tpu.memory_space<vmem>>, vector<32x32xf32>
    %cst_12 = arith.constant dense<0.000000e+00> : vector<32x128xf32>
    %24 = tpu.matmul %23, %22, %cst_12 {dimension_numbers = #tpu.dot_dimension_numbers<[1], [0], [0], [1], [0, 0, 1, 1], [], []>} : vector<32x32xf32>, vector<32x128xf32>, vector<32x128xf32> -> vector<32x128xf32>
    %c0_13 = arith.constant 0 : index
    %c0_14 = arith.constant 0 : index
    %25 = vector.load %arg7[%c0_13, %c0_14] : memref<32x1xf32, #tpu.memory_space<vmem>>, vector<32x1xf32>
    %26 = vector.broadcast %25 : vector<32x1xf32> to vector<32x128xf32>
    %27 = arith.addf %24, %26 : vector<32x128xf32>
    %28 = arith.mulf %27, %10 : vector<32x128xf32>
    %29 = arith.addf %7, %28 : vector<32x128xf32>
    %30 = math.tanh %29 : vector<32x128xf32>
    %c0_15 = arith.constant 0 : index
    %c0_16 = arith.constant 0 : index
    %31 = vector.load %arg8[%c0_15, %c0_16] : memref<4x32xf32, #tpu.memory_space<vmem>>, vector<4x32xf32>
    %cst_17 = arith.constant dense<0.000000e+00> : vector<4x128xf32>
    %32 = tpu.matmul %31, %30, %cst_17 {dimension_numbers = #tpu.dot_dimension_numbers<[1], [0], [0], [1], [0, 0, 1, 1], [], []>} : vector<4x32xf32>, vector<32x128xf32>, vector<4x128xf32> -> vector<4x128xf32>
    %c0_18 = arith.constant 0 : index
    %c0_19 = arith.constant 0 : index
    %33 = vector.load %arg9[%c0_18, %c0_19] : memref<4x1xf32, #tpu.memory_space<vmem>>, vector<4x1xf32>
    %34 = vector.broadcast %33 : vector<4x1xf32> to vector<4x128xf32>
    %35 = arith.addf %32, %34 : vector<4x128xf32>
    %c0_20 = arith.constant 0 : index
    %c0_21 = arith.constant 0 : index
    %36 = vector.load %arg10[%c0_20, %c0_21] : memref<4x128xf32, #tpu.memory_space<vmem>>, vector<4x128xf32>
    tpu.vector_store %arg10[%c0_20, %c0_21], %35 {strides = array<i32>} : memref<4x128xf32, #tpu.memory_space<vmem>>, vector<4x128xf32>,
    return
  }
  func.func @transform_0(%arg0: i32) -> (i32, i32) {
    %c0_i32 = arith.constant 0 : i32
    %c0_i32_0 = arith.constant 0 : i32
    return %arg0, %c0_i32 : i32, i32
  }
  func.func @transform_1(%arg0: i32) -> (i32, i32) {
    %c0_i32 = arith.constant 0 : i32
    %c0_i32_0 = arith.constant 0 : i32
    %c0_i32_1 = arith.constant 0 : i32
    return %c0_i32, %c0_i32_0 : i32, i32
  }
  func.func @transform_2(%arg0: i32) -> (i32, i32) {
    %c0_i32 = arith.constant 0 : i32
    %c0_i32_0 = arith.constant 0 : i32
    %c0_i32_1 = arith.constant 0 : i32
    return %c0_i32, %c0_i32_0 : i32, i32
  }
  func.func @transform_3(%arg0: i32) -> (i32, i32) {
    %c0_i32 = arith.constant 0 : i32
    %c0_i32_0 = arith.constant 0 : i32
    %c0_i32_1 = arith.constant 0 : i32
    return %c0_i32, %c0_i32_0 : i32, i32
  }
  func.func @transform_4(%arg0: i32) -> (i32, i32) {
    %c0_i32 = arith.constant 0 : i32
    %c0_i32_0 = arith.constant 0 : i32
    %c0_i32_1 = arith.constant 0 : i32
    return %c0_i32, %c0_i32_0 : i32, i32
  }
  func.func @transform_5(%arg0: i32) -> (i32, i32) {
    %c0_i32 = arith.constant 0 : i32
    %c0_i32_0 = arith.constant 0 : i32
    %c0_i32_1 = arith.constant 0 : i32
    return %c0_i32, %c0_i32_0 : i32, i32
  }
  func.func @transform_6(%arg0: i32) -> (i32, i32) {
    %c0_i32 = arith.constant 0 : i32
    %c0_i32_0 = arith.constant 0 : i32
    %c0_i32_1 = arith.constant 0 : i32
    return %c0_i32, %c0_i32_0 : i32, i32
  }
  func.func @transform_7(%arg0: i32) -> (i32, i32) {
    %c0_i32 = arith.constant 0 : i32
    %c0_i32_0 = arith.constant 0 : i32
    %c0_i32_1 = arith.constant 0 : i32
    return %c0_i32, %c0_i32_0 : i32, i32
  }
  func.func @transform_8(%arg0: i32) -> (i32, i32) {
    %c0_i32 = arith.constant 0 : i32
    %c0_i32_0 = arith.constant 0 : i32
    %c0_i32_1 = arith.constant 0 : i32
    return %c0_i32, %c0_i32_0 : i32, i32
  }
  func.func @transform_9(%arg0: i32) -> (i32, i32) {
    %c0_i32 = arith.constant 0 : i32
    %c0_i32_0 = arith.constant 0 : i32
    return %c0_i32, %arg0 : i32, i32
  }
}

</mosaic_0001>

<bundles_post_ra>
// kernel: tpu_custom_call.1
= control target key start
LH: loop header
LB: loop body
LE: loop exit
PB: predicated region body
PF: predicated region fallthrough
CT: control target
= control target key end

     0   :  { %14 = vsyncpa [#allocation3], 0  ;;  %s1902_s0 = inlined_call_operand.vmem [shape: f32[512,8], index: 0, kind: input, shape index: {}]   ;;  %s1903_s1 = inlined_call_operand.vmem [shape: f32[96,8], index: 1, kind: input, shape index: {}]   ;;  %s1904_s2 = inlined_call_operand.vmem [shape: f32[96,1], index: 2, kind: input, shape index: {}]   ;;  %s1905_s3 = inlined_call_operand.vmem [shape: f32[32,32], index: 3, kind: input, shape index: {}]   ;;  %s1906_s4 = inlined_call_operand.vmem [shape: f32[32,1], index: 4, kind: input, shape index: {}]   ;;  %s1907_s5 = inlined_call_operand.vmem [shape: f32[32,32], index: 5, kind: input, shape index: {}]   ;;  %s1908_s6 = inlined_call_operand.vmem [shape: f32[32,1], index: 6, kind: input, shape index: {}]   ;;  %s1909_s7 = inlined_call_operand.vmem [shape: f32[4,32], index: 7, kind: input, shape index: {}]   ;;  %s1910_s8 = inlined_call_operand.vmem [shape: f32[4,1], index: 8, kind: input, shape index: {}]   ;;  %s1911_s9 = inlined_call_operand.hbm [shape: f32[4,512], index: 9, kind: output, shape index: {}]  }
   0x1   :  { %16 = vsyncpa [#allocation3 + $0x1], 0  ;;  %s1556_s30 = smov 0   ;;  %s1558_s10 = smov 0  }
   0x2   :  { %s1560_s11 = smov 0   ;;  %s1562_s12 = smov 0  }
   0x3 LB: > { %s1577_s13 = sadd.s32 4294967295, %s1499_s12   ;;  %s1096_s14 = sadd.s32 4294967294, %s1499_s12   ;;  %s1499_s12 = sphi %s1562_s12, %s1919_s12   ;;  %s1495_s11 = sphi %s1560_s11, %s1918_s11   ;;  %s1491_s10 = sphi %s1558_s10, %s1917_s10   ;;  %s1487_s30 = sphi %s1556_s30, %s1916_s30  }
   0x4   : > { %s1581_s15 = sadd.s32 1, %s1499_s12   ;;  %s223_s16 = sadd.s32 1, %s1495_s11 }
   0x5   : > { %s220_s17 = ssub.s32 %s1499_s12, %s1581_s15  ;;  %p233_p0 = scmp.ne.s32.totalorder %s1495_s11, %s1491_s10 }
   0x6   : > { %p221_p1 = scmp.eq.s32.totalorder %s220_s17, 0  ;;  %p234_p2 = scmp.eq.s32.totalorder %s1577_s13, 3 }
   0x7   : > { %p239_p3 = scmp.ne.s32.totalorder %s1491_s10, %s1487_s30  ;;  %p240_p4 = scmp.eq.s32.totalorder %s1096_s14, 3 }
   0x8   : > { %s1592_s18 = scalar_select %p221_p1, %s1495_s11, %s223_s16  }
   0x9   : > { %p1594_p5 = por %p234_p2, %p233_p0  ;;  %p1598_p6 = por %p240_p4, %p239_p3 }
   0xa   : > { %p1099_p7 = scmp.ge.s32.totalorder %s1499_s12, 1  ;;  %p291_p8 = scmp.lt.s32.totalorder %s1499_s12, 5 }
   0xc   : > { %p292_p9 = pnand %p1099_p7, %p291_p8 }
   0xd   : > { %s1101_s21 = sshll.u32 (!%p292_p9), %s1577_s13, 4  ;;  %vm433_vm0 = vcmask (!%p292_p9), 64512   ;;  %v349_v0 = vld [vmem:[%s1903_s1] sm:$0xff] (!%p292_p9)  ;;  %v1501_v1 = vmov (!%p292_p9), 0   ;;  %v362_v5 = vld [vmem:[%s1904_s2 + $0x8] sm:$0xff] (!%p292_p9)  ;;  %v363_v13 = vld [vmem:[%s1904_s2 + $0x10] sm:$0xff] (!%p292_p9) }
   0xe   : > { %295 = sbr.rel (%p292_p9) target bundleno = 1059 (0x423), region = 56  ;;  %p328_p10 = scmp.lt.s32.totalorder (!%p292_p9), %s1101_s21, 63  ;;  %1225 = vmatprep.mubr.msk.f32.mxu0 (!%p292_p9), %vm433_vm0, %v349_v0  ;;  %1395 = vset.pattern.permute.xlu0 (!%p292_p9), %v1501_v1  ;;  %v361_v2 = vld [vmem:[%s1904_s2] sm:$0xff] (!%p292_p9)  ;;  %vm1622_vm1 = vmpackc.low (!%p292_p9), %vm433_vm0, %vm433_vm0  ;;  %v366_v6 = vld [vmem:[%s1904_s2 + $0x28] sm:$0xff] (!%p292_p9)  ;;  %vm695_vm2 = vcmask (!%p292_p9), 261120   ;;  %vm1503_vm3 = vmmov (!%p292_p9), 0  }
   0xf   : > { %1396 = vset.pattern.permute.xlu1 (!%p292_p9), %v1501_v1  ;;  %v365_v3 = vld [vmem:[%s1904_s2 + $0x20] sm:$0xff] (!%p292_p9)  ;;  %375 = vperm.xlu0 (!%p292_p9), %1395, %v361_v2   ;;  %v364_v14 = vld [vmem:[%s1904_s2 + $0x18] sm:$0xff] (!%p292_p9)  ;;  %v367_v17 = vld [vmem:[%s1904_s2 + $0x30] sm:$0xff] (!%p292_p9)  ;;  %s1141_s14 = sshll.u32 (!%p292_p9), %s1577_s13, 6  ;;  %s1505_s13 = smov (!%p292_p9), [#allocation2]  }
  0x10   : > { %395 = vperm.xlu1 (!%p292_p9), %1396, %v365_v3   ;;  %v368_v18 = vld [vmem:[%s1904_s2 + $0x38] sm:$0xff] (!%p292_p9)  ;;  %v369_v20 = vld [vmem:[%s1904_s2 + $0x40] sm:$0xff] (!%p292_p9)  ;;  %v370_v21 = vld [vmem:[%s1904_s2 + $0x48] sm:$0xff] (!%p292_p9)  ;;  %s1860_s24 = scalar_lea.hbm (!%p292_p9), %s1911_s9, %s1141_s14  ;;  %s1441_s27 = sshll.u32 (!%p292_p9), %s1505_s13, 4  ;;  %s1442_s27 = int_to_ptr.vmem [resolvable:$false] %s1441_s27 }
  0x11   : > { %v371_v24 = vld [vmem:[%s1904_s2 + $0x50] sm:$0xff] (!%p292_p9)  ;;  %v372_v25 = vld [vmem:[%s1904_s2 + $0x58] sm:$0xff] (!%p292_p9)  ;;  %v671_v27 = vld [vmem:[%s1906_s4] sm:$0xff] (!%p292_p9) }
  0x12   : > { %v672_v28 = vld [vmem:[%s1906_s4 + $0x8] sm:$0xff] (!%p292_p9)  ;;  %v673_v31 = vld [vmem:[%s1906_s4 + $0x10] sm:$0xff] (!%p292_p9)  ;;  %v674_v32 = vld [vmem:[%s1906_s4 + $0x18] sm:$0xff] (!%p292_p9) }
  0x13   : > { %380 = vperm.xlu0 (!%p292_p9), %1395, %v362_v5   ;;  %v809_v34 = vld [vmem:[%s1908_s6] sm:$0xff] (!%p292_p9)  ;;  %v810_v35 = vld [vmem:[%s1908_s6 + $0x8] sm:$0xff] (!%p292_p9)  ;;  %v811_v38 = vld [vmem:[%s1908_s6 + $0x10] sm:$0xff] (!%p292_p9) }
  0x14   : > { %400 = vperm.xlu1 (!%p292_p9), %1396, %v366_v6   ;;  %v812_v39 = vld [vmem:[%s1908_s6 + $0x18] sm:$0xff] (!%p292_p9)  ;;  %v943_v41 = vld [vmem:[%s1910_s8] sm:$0xf] (!%p292_p9)  ;;  %v350_v48 = vld [vmem:[%s1903_s1 + $0x8] sm:$0xff] (!%p292_p9) }
  0x15   : > { %s1921_s21 = smov (!%p328_p10, %s1101_s21), 63  ;;  %v351_v49 = vld [vmem:[%s1903_s1 + $0x10] sm:$0xff]  ;;  %v352_v50 = vld [vmem:[%s1903_s1 + $0x18] sm:$0xff]  ;;  %v353_v51 = vld [vmem:[%s1903_s1 + $0x20] sm:$0xff] }
  0x16   : > { %s1102_s28 = sshll.u32 %s1921_s21, 3  ;;  %v354_v52 = vld [vmem:[%s1903_s1 + $0x28] sm:$0xff]  ;;  %v355_v53 = vld [vmem:[%s1903_s1 + $0x30] sm:$0xff]  ;;  %v356_v54 = vld [vmem:[%s1903_s1 + $0x38] sm:$0xff] }
  0x17   : > { %s1618_s16 = scalar_lea.vmem %s1902_s0, %s1102_s28  ;;  %385 = vperm.xlu0 %1395, %v363_v13   ;;  %v357_v55 = vld [vmem:[%s1903_s1 + $0x40] sm:$0xff]  ;;  %v358_v56 = vld [vmem:[%s1903_s1 + $0x48] sm:$0xff]  ;;  %v359_v57 = vld [vmem:[%s1903_s1 + $0x50] sm:$0xff]  ;;  %s1443_s28 = scalar_lea.vmem %s1442_s27, 128 }
  0x18   : > { %v333_v7 = vld [vmem:[%s1618_s16] sm:$0xff]  ;;  %v334_v8 = vld [vmem:[%s1618_s16 + $0x8] sm:$0xff]  ;;  %v335_v9 = vld [vmem:[%s1618_s16 + $0x10] sm:$0xff]  ;;  %390 = vperm.xlu1 %1396, %v364_v14  }
  0x19   : > { %v1282_v10 = vpack.c.bf16 %v334_v8, %v333_v7  ;;  %v336_v11 = vld [vmem:[%s1618_s16 + $0x18] sm:$0xff]  ;;  %v337_v15 = vld [vmem:[%s1618_s16 + $0x20] sm:$0xff]  ;;  %v338_v16 = vld [vmem:[%s1618_s16 + $0x28] sm:$0xff] }
  0x1a   : > { %v1288_v12 = vpack.c.bf16 %v336_v11, %v335_v9  ;;  %v1294_v19 = vpack.c.bf16 %v338_v16, %v337_v15  ;;  %v339_v22 = vld [vmem:[%s1618_s16 + $0x30] sm:$0xff]  ;;  %v340_v23 = vld [vmem:[%s1618_s16 + $0x38] sm:$0xff]  ;;  %v341_v29 = vld [vmem:[%s1618_s16 + $0x40] sm:$0xff] }
  0x1b   : > { %1284 = vmatprep.subr.msk.bf16.mxu0 %vm1622_vm1, %v1282_v10  ;;  %405 = vperm.xlu0 %1395, %v367_v17   ;;  %v1300_v26 = vpack.c.bf16 %v340_v23, %v339_v22  ;;  %v342_v30 = vld [vmem:[%s1618_s16 + $0x48] sm:$0xff]  ;;  %v343_v36 = vld [vmem:[%s1618_s16 + $0x50] sm:$0xff]  ;;  %v344_v37 = vld [vmem:[%s1618_s16 + $0x58] sm:$0xff] }
  0x1c   : > { %1287 = vmatpush3.bf16.xpose.msk.msra.mxu0 %vm1622_vm1, %v1282_v10  ;;  %410 = vperm.xlu1 %1396, %v368_v18   ;;  %v1306_v33 = vpack.c.bf16 %v342_v30, %v341_v29  ;;  %v1312_v40 = vpack.c.bf16 %v344_v37, %v343_v36  ;;  %v345_v42 = vld [vmem:[%s1618_s16 + $0x60] sm:$0xff]  ;;  %v346_v43 = vld [vmem:[%s1618_s16 + $0x68] sm:$0xff]  ;;  %v347_v45 = vld [vmem:[%s1618_s16 + $0x70] sm:$0xff] }
  0x1d   : > { %1290 = vmatprep.subr.msk.bf16.mxu0 %vm1622_vm1, %v1288_v12  ;;  %v1318_v44 = vpack.c.bf16 %v346_v43, %v345_v42  ;;  %v348_v46 = vld [vmem:[%s1618_s16 + $0x78] sm:$0xff]  ;;  %v667_v59 = vld [vmem:[%s1905_s3] sm:$0xff]  ;;  %s324_s16 = sand.u32 1, %s1491_s10  }
  0x1e   : > { %v1324_v47 = vpack.c.bf16 %v348_v46, %v347_v45  ;;  %v360_v58 = vld [vmem:[%s1903_s1 + $0x58] sm:$0xff]  ;;  %1251 = vmatprep.mubr.msk.f32.mxu1 %vm695_vm2, %v667_v59  ;;  %v669_v59 = vld [vmem:[%s1905_s3 + $0x10] sm:$0xff]  ;;  %s1100_s29 = sshll.u32 %s324_s16, 2  ;;  %s1024_s25 = scalar_lea.sflag [#allocation3], %s324_s16 }
  0x1f   : > { %415 = vperm.xlu0 %1395, %v369_v20   ;;  %s326_s17 = scalar_lea.vmem [#allocation2], %s1100_s29 }
  0x20   : > { %420 = vperm.xlu1 %1396, %v370_v21   ;;  %s1037_s22 = sshll.u32 %s326_s17, 4  ;;  %s1862_s22 = int_to_ptr.vmem [resolvable:$true] %s1037_s22 }
  0x21   : > { %s1437_s26 = scalar_lea.vmem %s1862_s22, 64  ;;  %p1444_p0 = scmp.lt.s32.totalorder %s1862_s22, %s1442_s27 }
  0x22   : > { %p1438_p11 = scmp.ne.s32.totalorder %s1862_s22, %s1437_s26  ;;  %p1445_p1 = scmp.lt.s32.totalorder %s1443_s28, %s1437_s26 }
  0x23   : > { %425 = vperm.xlu0 %1395, %v371_v24  }
  0x24   : > { %1293 = vmatpush3.bf16.xpose.msk.msra.mxu0 %vm1622_vm1, %v1288_v12  ;;  %430 = vperm.xlu1 %1396, %v372_v25   ;;  %p1439_p12 = pnand %p1438_p11, %p1594_p5  ;;  %p1446_p2 = por %p1445_p1, %p1444_p0 }
  0x25   : > { %1296 = vmatprep.subr.msk.bf16.mxu0 %vm1622_vm1, %v1294_v19 }
  0x26   : > { %p1440_p13 = pneg %p1439_p12 }
  0x27   : > { %677 = vperm.xlu0 %1395, %v671_v27  }
  0x28   : > { %682 = vperm.xlu1 %1396, %v672_v28   ;;  %p1447_p3 = pnand %p1446_p2, %p1440_p13 }
  0x2b   : > { %687 = vperm.xlu0 %1395, %v673_v31  }
  0x2c   : > { %1299 = vmatpush3.bf16.xpose.msk.msra.mxu0 %vm1622_vm1, %v1294_v19  ;;  %692 = vperm.xlu1 %1396, %v674_v32  }
  0x2d   : > { %1302 = vmatprep.subr.msk.bf16.mxu0 %vm1622_vm1, %v1300_v26 }
  0x2f   : > { %815 = vperm.xlu0 %1395, %v809_v34  }
  0x30   : > { %820 = vperm.xlu1 %1396, %v810_v35  }
  0x33   : > { %825 = vperm.xlu0 %1395, %v811_v38  }
  0x34   : > { %1305 = vmatpush3.bf16.xpose.msk.msra.mxu0 %vm1622_vm1, %v1300_v26  ;;  %830 = vperm.xlu1 %1396, %v812_v39  }
  0x35   : > { %1308 = vmatprep.subr.msk.bf16.mxu0 %vm1622_vm1, %v1306_v33 }
  0x37   : > { %946 = vperm.xlu0 %1395, %v943_v41  }
  0x3c   : > { %1311 = vmatpush3.bf16.xpose.msk.msra.mxu0 %vm1622_vm1, %v1306_v33 }
  0x3d   : > { %1314 = vmatprep.subr.msk.bf16.mxu0 %vm1622_vm1, %v1312_v40 }
  0x44   : > { %1317 = vmatpush3.bf16.xpose.msk.msra.mxu0 %vm1622_vm1, %v1312_v40 }
  0x45   : > { %1320 = vmatprep.subr.msk.bf16.mxu0 %vm1622_vm1, %v1318_v44 }
  0x4c   : > { %1323 = vmatpush3.bf16.xpose.msk.msra.mxu0 %vm1622_vm1, %v1318_v44 }
  0x4d   : > { %1326 = vmatprep.subr.msk.bf16.mxu0 %vm1622_vm1, %v1324_v47 }
  0x54   : > { %1329 = vmatpush3.bf16.xpose.msk.msra.mxu0 %vm1622_vm1, %v1324_v47 }
  0x5b   : > { %1226 = vmatmul.mubr.msk.f32.vlgmr.msra.gmra.mrb[0].mxu0 %vm433_vm0, %v350_v48 }
  0x5c   : > { %1228 = vmatprep.mubr.msk.f32.mxu0 %vm433_vm0, %v351_v49 }
  0x5f   : > { %1229 = vmatmul.mubr.msk.f32.gmra.mrb[2].mxu0 %vm433_vm0, %v352_v50 }
  0x60   : > { %1231 = vmatprep.mubr.msk.f32.mxu0 %vm433_vm0, %v353_v51 }
  0x63   : > { %1232 = vmatmul.mubr.msk.f32.gmra.mrb[4].mxu0 %vm433_vm0, %v354_v52 }
  0x64   : > { %1234 = vmatprep.mubr.msk.f32.mxu0 %vm433_vm0, %v355_v53 }
  0x67   : > { %1235 = vmatmul.mubr.msk.f32.gmra.mrb[6].mxu0 %vm433_vm0, %v356_v54 }
  0x68   : > { %1237 = vmatprep.mubr.msk.f32.mxu0 %vm433_vm0, %v357_v55 }
  0x6b   : > { %1238 = vmatmul.mubr.msk.f32.gmra.mrb[8].mxu0 %vm433_vm0, %v358_v56 }
  0x6c   : > { %1240 = vmatprep.mubr.msk.f32.mxu0 %vm433_vm0, %v359_v57 }
  0x6f   : > { %1241 = vmatmul.mubr.msk.f32.gmra.mrb[10].mxu0 %vm433_vm0, %v360_v58  ;;  %v668_v58 = vld [vmem:[%s1905_s3 + $0x8] sm:$0xff] }
  0x8e   : > { %v376_v61 = vpop.permute.xlu0 %375 }
  0x8f   : > { %v396_v60 = vpop.permute.xlu1 %395 }
  0x92   : > { %v381_v0 = vpop.permute.xlu0 %380 }
  0x93   : > { %v401_v62 = vpop.permute.xlu1 %400 }
  0x96   : > { %v386_v7 = vpop.permute.xlu0 %385 }
  0x97   : > { %v391_v5 = vpop.permute.xlu1 %390 }
  0x9a   : > { %v406_v16 = vpop.permute.xlu0 %405 }
  0x9b   : > { %v411_v14 = vpop.permute.xlu1 %410 }
  0x9e   : > { %v416_v25 = vpop.permute.xlu0 %415 }
  0x9f   : > { %v421_v23 = vpop.permute.xlu1 %420 }
  0xa2   : > { %v426_v41 = vpop.permute.xlu0 %425 }
  0xa3   : > { %v431_v38 = vpop.permute.xlu1 %430 }
 0x12e   : > { %v1227_v63 = vpop.f32.mrb[0].mxu0 }
 0x12f   : > { %v584_v1 = vpop.f32.mrb[1].mxu0  ;;  %v590_v3 = vadd.f32 %v1227_v63, %v381_v0  ;;  %v678_v63 = vpop.permute.xlu0 %677 }
 0x130   : > { %v585_v6 = vadd.f32 %v584_v1, %v376_v61  ;;  %v805_v61 = vld [vmem:[%s1907_s5] sm:$0xff] }
 0x131   : > { %1397 = vtanh.f32 %v590_v3 }
 0x132   : > { %v1230_v2 = vpop.f32.mrb[2].mxu0  ;;  %1399 = vtanh.f32 %v585_v6 }
 0x133   : > { %v594_v4 = vpop.f32.mrb[3].mxu0  ;;  %v600_v9 = vadd.f32 %v1230_v2, %v391_v5 }
 0x134   : > { %v595_v12 = vadd.f32 %v594_v4, %v386_v7 }
 0x136   : > { %v1233_v8 = vpop.f32.mrb[4].mxu0 }
 0x137   : > { %v610_v10 = vadd.f32 %v1233_v8, %v401_v62  ;;  %v604_v11 = vpop.f32.mrb[5].mxu0  ;;  %v683_v62 = vpop.permute.xlu1 %682 }
 0x138   : > { %v605_v13 = vadd.f32 %v604_v11, %v396_v60  ;;  %v670_v60 = vld [vmem:[%s1905_s3 + $0x18] sm:$0xff]  ;;  %v688_v8 = vpop.permute.xlu0 %687 }
 0x139   : > { %1401 = vtanh.f32 %v610_v10 }
 0x13a   : > { %1403 = vtanh.f32 %v605_v13  ;;  %v1236_v15 = vpop.f32.mrb[6].mxu0 }
 0x13b   : > { %1405 = vtanh.f32 %v600_v9  ;;  %v620_v17 = vadd.f32 %v1236_v15, %v411_v14  ;;  %v614_v18 = vpop.f32.mrb[7].mxu0  ;;  %v1779_v22 = vpop.eup %1397 }
 0x13c   : > { %1407 = vtanh.f32 %v595_v12  ;;  %v615_v19 = vadd.f32 %v614_v18, %v406_v16  ;;  %v1781_v24 = vpop.eup %1399  ;;  %v693_v5 = vpop.permute.xlu1 %692 }
 0x13d   : > { %1409 = vtanh.f32 %v620_v17 }
 0x13e   : > { %1411 = vtanh.f32 %v615_v19  ;;  %v1239_v20 = vpop.f32.mrb[8].mxu0 }
 0x13f   : > { %v624_v21 = vpop.f32.mrb[9].mxu0  ;;  %v630_v30 = vadd.f32 %v1239_v20, %v421_v23 }
 0x140   : > { %v625_v33 = vadd.f32 %v624_v21, %v416_v25 }
 0x142   : > { %v1242_v26 = vpop.f32.mrb[10].mxu0 }
 0x143   : > { %v1402_v27 = vpop.eup %1401  ;;  %v634_v28 = vpop.f32.mrb[11].mxu0  ;;  %v640_v43 = vadd.f32 %v1242_v26, %v431_v38  ;;  %v806_v26 = vld [vmem:[%s1907_s5 + $0x8] sm:$0xff] }
 0x144   : > { %v1404_v29 = vpop.eup %1403  ;;  %v1784_v31 = vsub.f32 %v1402_v27, %v1779_v22  ;;  %v635_v46 = vadd.f32 %v634_v28, %v426_v41  ;;  %v807_v27 = vld [vmem:[%s1907_s5 + $0x10] sm:$0xff]  ;;  %v808_v28 = vld [vmem:[%s1907_s5 + $0x18] sm:$0xff] }
 0x145   : > { %v1786_v32 = vpop.eup %1405  ;;  %v1789_v34 = vsub.f32 %v1404_v29, %v1781_v24  ;;  %v1502_v29 = vmov 0.0|0.0  }
 0x146   : > { %v1791_v35 = vpop.eup %1407  ;;  %v656_v36 = vmul.f32 %v1784_v31, %v630_v30  ;;  %v1504_v30 = vmov 0.0  }
 0x147   : > { %v1410_v37 = vpop.eup %1409  ;;  %v655_v39 = vmul.f32 %v1789_v34, %v625_v33  ;;  %v821_v33 = vpop.permute.xlu1 %820 }
 0x148   : > { %v1412_v40 = vpop.eup %1411  ;;  %v660_v42 = vadd.f32 %v1779_v22, %v656_v36  ;;  %v1797_v44 = vsub.f32 %v1410_v37, %v1786_v32  ;;  %v816_v36 = vpop.permute.xlu0 %815 }
 0x149   : > { %v659_v45 = vadd.f32 %v1781_v24, %v655_v39  ;;  %v1801_v47 = vsub.f32 %v1412_v40, %v1791_v35 }
 0x14a   : > { %1413 = vtanh.f32 %v660_v42  ;;  %v658_v48 = vmul.f32 %v1797_v44, %v640_v43 }
 0x14b   : > { %1415 = vtanh.f32 %v659_v45  ;;  %v657_v49 = vmul.f32 %v1801_v47, %v635_v46  ;;  %v831_v42 = vpop.permute.xlu1 %830 }
 0x14c   : > { %v662_v50 = vadd.f32 %v1786_v32, %v658_v48  ;;  %v826_v46 = vpop.permute.xlu0 %825 }
 0x14d   : > { %v661_v51 = vadd.f32 %v1791_v35, %v657_v49 }
 0x14e   : > { %1417 = vtanh.f32 %v662_v50 }
 0x14f   : > { %1419 = vtanh.f32 %v661_v51 }
 0x154   : > { %v1414_v52 = vpop.eup %1413 }
 0x155   : > { %v1416_v53 = vpop.eup %1415 }
 0x156   : > { %v1330_v54 = vpack.c.bf16 %v1414_v52, %v1416_v53 }
 0x158   : > { %v1418_v55 = vpop.eup %1417  ;;  %1331 = vmatprep.subr.bf16.mxu1 %v1330_v54 }
 0x159   : > { %v1420_v56 = vpop.eup %1419  ;;  %1333 = vmatpush3.bf16.msra.mxu1 %v1330_v54 }
 0x15a   : > { %v1334_v57 = vpack.c.bf16 %v1418_v55, %v1420_v56 }
 0x15c   : > { %1335 = vmatprep.subr.bf16.mxu1 %v1334_v57 }
 0x15d   : > { %1337 = vmatpush3.bf16.msra.mxu1 %v1334_v57 }
 0x160   : > { %1252 = vmatmul.mubr.msk.f32.vlgmr.msra.gmra.mrb[0].mxu1 %vm695_vm2, %v668_v58 }
 0x161   : > { %1254 = vmatprep.mubr.msk.f32.mxu1 %vm695_vm2, %v669_v59 }
 0x164   : > { %1255 = vmatmul.mubr.msk.f32.gmra.mrb[2].mxu1 %vm695_vm2, %v670_v60 }
 0x165   : > { %1265 = vmatprep.mubr.msk.f32.mxu1 %vm695_vm2, %v805_v61 }
 0x233   : > { %v1253_v0 = vpop.f32.mrb[0].mxu1 }
 0x234   : > { %v780_v1 = vadd.f32 %v1253_v0, %v683_v62  ;;  %v774_v2 = vpop.f32.mrb[1].mxu1 }
 0x235   : > { %v775_v3 = vadd.f32 %v774_v2, %v678_v63 }
 0x236   : > { %v794_v4 = vmul.f32 %v780_v1, %v1784_v31 }
 0x237   : > { %v793_v6 = vmul.f32 %v775_v3, %v1789_v34  ;;  %v1256_v7 = vpop.f32.mrb[2].mxu1 }
 0x238   : > { %v798_v9 = vadd.f32 %v1779_v22, %v794_v4  ;;  %v790_v10 = vadd.f32 %v1256_v7, %v693_v5  ;;  %v784_v11 = vpop.f32.mrb[3].mxu1 }
 0x239   : > { %v797_v12 = vadd.f32 %v1781_v24, %v793_v6  ;;  %v785_v13 = vadd.f32 %v784_v11, %v688_v8 }
 0x23a   : > { %1421 = vtanh.f32 %v798_v9  ;;  %v796_v14 = vmul.f32 %v790_v10, %v1797_v44 }
 0x23b   : > { %1423 = vtanh.f32 %v797_v12  ;;  %v795_v15 = vmul.f32 %v785_v13, %v1801_v47 }
 0x23c   : > { %v800_v16 = vadd.f32 %v1786_v32, %v796_v14 }
 0x23d   : > { %v799_v17 = vadd.f32 %v1791_v35, %v795_v15 }
 0x23e   : > { %1425 = vtanh.f32 %v800_v16 }
 0x23f   : > { %1427 = vtanh.f32 %v799_v17 }
 0x244   : > { %v1422_v18 = vpop.eup %1421 }
 0x245   : > { %v1424_v19 = vpop.eup %1423 }
 0x246   : > { %v1338_v20 = vpack.c.bf16 %v1422_v18, %v1424_v19 }
 0x248   : > { %v1426_v21 = vpop.eup %1425  ;;  %1339 = vmatprep.subr.bf16.mxu1 %v1338_v20 }
 0x249   : > { %v1428_v23 = vpop.eup %1427  ;;  %1341 = vmatpush3.bf16.msra.mxu1 %v1338_v20 }
 0x24a   : > { %v1342_v25 = vpack.c.bf16 %v1426_v21, %v1428_v23 }
 0x24c   : > { %1343 = vmatprep.subr.bf16.mxu1 %v1342_v25 }
 0x24d   : > { %1345 = vmatpush3.bf16.msra.mxu1 %v1342_v25 }
 0x24e   : > { %1346 = vmatprep.subr.bf16.mxu1 %v1502_v29 }
 0x250   : > { %1266 = vmatmul.mubr.msk.f32.vlgmr.msra.gmra.mrb[4].mxu1 %vm695_vm2, %v806_v26 }
 0x251   : > { %1268 = vmatprep.mubr.msk.f32.mxu1 %vm695_vm2, %v807_v27 }
 0x254   : > { %1269 = vmatmul.mubr.msk.f32.gmra.mrb[6].mxu1 %vm695_vm2, %v808_v28 }
 0x255   : > { %1279 = vmatprep.mubr.msk.f32.mxu1 %vm1503_vm3, %v1504_v30 }
 0x323   : > { %v1267_v37 = vpop.f32.mrb[4].mxu1 }
 0x324   : > { %v917_v38 = vadd.f32 %v1267_v37, %v821_v33  ;;  %v911_v39 = vpop.f32.mrb[5].mxu1 }
 0x325   : > { %v912_v40 = vadd.f32 %v911_v39, %v816_v36 }
 0x326   : > { %v931_v41 = vmul.f32 %v917_v38, %v1784_v31 }
 0x327   : > { %v930_v43 = vmul.f32 %v912_v40, %v1789_v34  ;;  %v1270_v45 = vpop.f32.mrb[6].mxu1 }
 0x328   : > { %v935_v48 = vadd.f32 %v1779_v22, %v931_v41  ;;  %v927_v49 = vadd.f32 %v1270_v45, %v831_v42  ;;  %v921_v50 = vpop.f32.mrb[7].mxu1 }
 0x329   : > { %v934_v51 = vadd.f32 %v1781_v24, %v930_v43  ;;  %v922_v52 = vadd.f32 %v921_v50, %v826_v46 }
 0x32a   : > { %1429 = vtanh.f32 %v935_v48  ;;  %v933_v53 = vmul.f32 %v927_v49, %v1797_v44  ;;  %v942_v44 = vld [vmem:[%s1909_s7] sm:$0xf] }
 0x32b   : > { %1431 = vtanh.f32 %v934_v51  ;;  %v932_v54 = vmul.f32 %v922_v52, %v1801_v47 }
 0x32c   : > { %v937_v31 = vadd.f32 %v1786_v32, %v933_v53  ;;  %v947_v32 = vpop.permute.xlu0 %946 }
 0x32d   : > { %v936_v34 = vadd.f32 %v1791_v35, %v932_v54 }
 0x32e   : > { %1433 = vtanh.f32 %v937_v31 }
 0x32f   : > { %1435 = vtanh.f32 %v936_v34 }
 0x334   : > { %v1430_v22 = vpop.eup %1429 }
 0x335   : > { %v1432_v55 = vpop.eup %1431 }
 0x336   : > { %v1347_v56 = vpack.c.bf16 %v1430_v22, %v1432_v55 }
 0x338   : > { %v1434_v57 = vpop.eup %1433  ;;  %1348 = vmatpush3.bf16.msra.mxu1 %v1347_v56 }
 0x339   : > { %v1436_v24 = vpop.eup %1435  ;;  %1349 = vmatprep.subr.bf16.mxu1 %v1502_v29 }
 0x33a   : > { %v1350_v58 = vpack.c.bf16 %v1434_v57, %v1436_v24 }
 0x33c   : > { %1351 = vmatpush3.bf16.msra.mxu1 %v1350_v58 }
 0x33f   : > { %1280 = vmatmul.mubr.msk.f32.vlgmr.msra.gmra.mrb[8].mxu1 %vm695_vm2, %v942_v44 }
 0x412   : > { %v1018_v35 = vpop.f32.mrb[8].mxu1 }
 0x413   : > { %v1019_v47 = vadd.f32 %v1018_v35, %v947_v32  ;;  %v1281_v59 = vpop.f32.mrb[9].mxu1 }
 0x415   : > { %1022 = vst [vmem:[%s326_s17] sm:$0xf] %v1019_v47 }
 0x416   : > { %1450 = shalt.err (!%p1447_p3)
}
 0x417   : > { %s1451_s16 = scalar_lea.hbm %s1860_s24, 64  ;;  %s1455_s17 = scalar_lea.hbm %s1911_s9, 256 }
 0x418   : > { %p1452_p4 = scmp.ne.s32.totalorder %s1860_s24, %s1451_s16  ;;  %p1456_p9 = scmp.lt.u32.totalorder %s1860_s24, %s1911_s9 }
 0x419   : > { %p1457_p10 = scmp.lt.u32.totalorder %s1455_s17, %s1451_s16  ;;  %p1459_p12 = scmp.lt.u32.totalorder %s1451_s16, %s1860_s24 }
 0x41a   : > { %p1453_p7 = pnand %p1452_p4, %p1594_p5 }
 0x41b   : > { %p1458_p11 = por %p1457_p10, %p1456_p9 }
 0x41c   : > { %p1454_p8 = pneg %p1453_p7 }
 0x41d   : > { %p1460_p13 = por %p1459_p12, %p1458_p11 }
 0x41f   : > { %p1461_p0 = pnand %p1460_p13, %p1454_p8 }
 0x421   : > { %1464 = shalt.err (!%p1461_p0)
}
 0x422   : > { %1352 = dma.vmem_to_hbm [thread:$0]  (%p1594_p5), %s1862_s22, 64, %s1860_s24, %s1024_s25  }
 0x423 PF: > { %p1358_p1 = scmp.ge.s32.totalorder %s1499_s12, 2  ;;  %s1049_s26 = sand.u32 1, %s1487_s30  }
 0x424   : > { %s1050_s13 = scalar_lea.sflag [#allocation3], %s1049_s26 }
 0x425   : > { %p1355_p2 = pnand %p1358_p1, %p1598_p6 }
 0x427   : > { %1482 = dma.done.wait (!%p1355_p2), %s1050_s13, 64  }
 0x428   : > { %1484 = vsyncadd (!%p1355_p2), %s1050_s13, 4294967232  ;;  %p19_p3 = scmp.ge.s32.totalorder %s1581_s15, 6   ;;  %s1916_s30 = smov %s1491_s10 }
 0x429   : > { %s1917_s10 = smov %s1495_s11  ;;  %s1918_s11 = smov %s1592_s18 }
 0x42a   : > { %s1919_s12 = smov %s1581_s15  ;;  %21 = sbr.rel (!%p19_p3) target bundleno = 3 (0x3), region = 91 }
 0x431   :  { %1055 = vsyncpa [#allocation3], 1 }
 0x432   :  { %1057 = vsyncpa [#allocation3 + $0x1], 1 }

</bundles_post_ra>
